<compile_context>
chip_gen: v7x
topology: tpu7x:2x2x1
jax: 0.10.0
libtpu: 0.0.40
codegen_flags: <defaults>
</compile_context>

<pallas_src>
import functools

import jax
import jax.numpy as jnp
from jax import lax
from jax.experimental import pallas as pl
from jax.experimental.pallas import tpu as pltpu

MARGIN = 1.0   # nn.TripletMarginLoss default margin
EPS = 1e-6     # F.pairwise_distance default eps (added to the difference)


def _round_up(x, m):
    return ((x + m - 1) // m) * m


def _triplet_gather_kernel(idx_ref, table_ref, out_ref, gathered, sem, *,
                           batch, batch_pad, n_copies):
    """Index-driven embedding row gather + fused triplet losses.

    idx_ref   : SMEM (7*batch_pad,) int32 scalar-prefetch, layout
                [a | p0 | p1 | p2 | n0 | n1 | n2], each of length batch_pad.
    table_ref : (n_nodes, D) embedding table, left in HBM (pl.ANY).
    gathered  : VMEM (7, batch_pad, D) scratch in the table's native dtype.
    sem       : single shared DMA semaphore for all row copies.
    """
    # ---- gather: one async row DMA (HBM -> VMEM) per embedding needed ------
    for grp in range(7):                       # static; group index is static
        base = grp * batch_pad

        def issue(b, carry, base=base, grp=grp):
            row = idx_ref[base + b]            # assumed in [0, n_nodes)
            pltpu.make_async_copy(
                table_ref.at[pl.ds(row, 1), :],        # (1, D) in HBM
                gathered.at[grp, pl.ds(b, 1), :],      # (1, D) in VMEM
                sem,
            ).start()
            return carry

        lax.fori_loop(0, batch_pad, issue, 0)

    # Drain: every wait consumes exactly one row-copy's worth of the shared
    # semaphore; after n_copies waits all gathers have landed.
    def drain(i, carry):
        pltpu.make_async_copy(
            table_ref.at[pl.ds(0, 1), :],
            gathered.at[0, pl.ds(0, 1), :],
            sem,
        ).wait()
        return carry

    lax.fori_loop(0, n_copies, drain, 0)

    # ---- 6 unique distances + 5 chained hinges, mean over batch ------------
    g = gathered[...].astype(jnp.float32)      # (7, B_pad, D)
    a = g[0]                                   # anchors            (B_pad, D)
    others = g[1:]                             # [p0,p1,p2,n0,n1,n2] (6,B_pad,D)

    # PyTorch F.pairwise_distance: ||x1 - x2 + eps||_2 along the last dim.
    diff = a[None] - others + EPS
    dists = jnp.sqrt(jnp.sum(diff * diff, axis=-1))          # (6, B_pad)

    # hinge_j = max(d[j] - d[j+1] + margin, 0) over the consecutive distance
    # groups [p0, p1, p2, n0, n1, n2] -> one vectorized maximum.
    hinges = jnp.maximum(dists[0:5] - dists[1:6] + MARGIN, 0.0)  # (5, B_pad)

    if batch_pad != batch:                     # mask padded batch rows
        valid = lax.broadcasted_iota(jnp.int32, (5, batch_pad), 1) < batch
        hinges = jnp.where(valid, hinges, 0.0)

    per_term = jnp.sum(hinges, axis=1, keepdims=True)            # (5, 1)
    out_ref[...] = (jnp.sum(per_term, axis=0, keepdims=True)
                    * jnp.float32(1.0 / batch))                  # (1, 1)


@jax.jit
def triplet_embedding_loss(a_idx, p_idx, n_idx, table):
    """a_idx: (B,) int, p_idx/n_idx: (B, 3) int, table: (n_nodes, n_dims)."""
    B = a_idx.shape[0]
    n_nodes, D = table.shape
    B_pad = _round_up(B, 8)                    # keep sublane-tile alignment
    n_copies = 7 * B_pad

    # Flat index layout: [a | p0 | p1 | p2 | n0 | n1 | n2], each length B_pad.
    idx = jnp.stack(
        [a_idx.reshape(-1),
         p_idx[:, 0], p_idx[:, 1], p_idx[:, 2],
         n_idx[:, 0], n_idx[:, 1], n_idx[:, 2]], axis=0).astype(jnp.int32)
    if B_pad != B:
        idx = jnp.pad(idx, ((0, 0), (0, B_pad - B)))   # pad rows gather row 0
    idx = idx.reshape(-1)                              # (7 * B_pad,)

    kernel = functools.partial(_triplet_gather_kernel,
                               batch=B, batch_pad=B_pad, n_copies=n_copies)

    out = pl.pallas_call(
        kernel,
        out_shape=jax.ShapeDtypeStruct((1, 1), jnp.float32),
        grid_spec=pltpu.PrefetchScalarGridSpec(
            num_scalar_prefetch=1,             # idx -> SMEM before kernel runs
            grid=(1,),
            in_specs=[pl.BlockSpec(memory_space=pl.ANY)],  # table stays in HBM
            out_specs=pl.BlockSpec((1, 1), lambda i, idx_ref: (0, 0)),
            scratch_shapes=[
                pltpu.VMEM((7, B_pad, D), table.dtype),    # gathered rows
                pltpu.SemaphoreType.DMA,                   # shared gather sem
            ],
        ),
        compiler_params=pltpu.CompilerParams(
            dimension_semantics=("arbitrary",)),
    )(idx, table)
    return out[0, 0]


def _reference_loss(a_idx, p_idx, n_idx, table):
    """Pure-JAX reference mirroring the PyTorch forward."""
    a = table[a_idx]          # (B, D)
    p = table[p_idx]          # (B, 3, D)
    n = table[n_idx]          # (B, 3, D)

    def d(x, y):
        return jnp.sqrt(jnp.sum((x - y + EPS) ** 2, axis=-1))

    def trip(anc, pos, neg):
        return jnp.mean(jnp.maximum(d(anc, pos) - d(anc, neg) + MARGIN, 0.0))

    return (trip(a, p[:, 0], p[:, 1]) + trip(a, p[:, 1], p[:, 2])
            + trip(a, p[:, 2], n[:, 0]) + trip(a, n[:, 0], n[:, 1])
            + trip(a, n[:, 1], n[:, 2]))


if __name__ == "__main__":
    n_nodes, n_dims, batch = 32, 128, 8

    key = jax.random.PRNGKey(0)
    k_table, k_a, k_p, k_n = jax.random.split(key, 4)

    # nn.Embedding weights ~ N(0, 1), deterministic here.
    table = jax.random.normal(k_table, (n_nodes, n_dims), dtype=jnp.float32)
    a_idx = jax.random.randint(k_a, (batch,), 0, n_nodes, dtype=jnp.int32)
    p_idx = jax.random.randint(k_p, (batch, 3), 0, n_nodes, dtype=jnp.int32)
    n_idx = jax.random.randint(k_n, (batch, 3), 0, n_nodes, dtype=jnp.int32)

    loss = triplet_embedding_loss(a_idx, p_idx, n_idx, table)
    jax.block_until_ready(loss)

    ref = _reference_loss(a_idx, p_idx, n_idx, table)
    assert jnp.allclose(loss, ref, atol=1e-5, rtol=1e-5), (loss, ref)

    print("KERNEL_OK")
</pallas_src>

<mosaic_0001>
module attributes {stable_mosaic.version = 11 : i64} {
  func.func @_triplet_gather_kernel(%arg0: i32, %arg1: memref<56xi32, #tpu.memory_space<smem>>, %arg2: memref<32x128xf32, #tpu.memory_space<any>>, %arg3: memref<1x1xf32, #tpu.memory_space<vmem>>, %arg4: memref<7x8x128xf32, #tpu.memory_space<vmem>>, %arg5: memref<!tpu.dma_semaphore, #tpu.memory_space<semaphore_mem>>) attributes {dimension_semantics = [#tpu.dimension_semantics<arbitrary>], iteration_bounds = array<i64: 1>, scalar_prefetch = 1 : i64, scratch_operands = 2 : i64, tpu.core_type = #tpu.core_type<tc>, window_params = [{}, {pipeline_mode = #tpu.pipeline_mode<synchronous>, transform_indices = @transform_1, window_bounds = array<i64: 1, 1>}]} {
    %c0_i32 = arith.constant 0 : i32
    %c8_i32 = arith.constant 8 : i32
    %0 = arith.addi %c0_i32, %c8_i32 : i32
    %c1_i32 = arith.constant 1 : i32
    scf.for %arg6 = %c0_i32 to %0 step %c1_i32  : i32 {
      %c0_i32_37 = arith.constant 0 : i32
      %34 = arith.addi %c0_i32_37, %arg6 : i32
      %35 = arith.index_cast %34 : i32 to index
      %36 = memref.load %arg1[%35] : memref<56xi32, #tpu.memory_space<smem>>
      %c0_i32_38 = arith.constant 0 : i32
      %c0_i32_39 = arith.constant 0 : i32
      %37 = tpu.memref_slice %arg2[%36, %c0_i32_39] : memref<32x128xf32, #tpu.memory_space<any>> -> memref<1x128xf32, #tpu.memory_space<any>>
      %c0_i32_40 = arith.constant 0 : i32
      %38 = tpu.memref_slice %arg4[%c0_i32_38, %arg6, %c0_i32_40] : memref<7x8x128xf32, #tpu.memory_space<vmem>> -> memref<1x1x128xf32, #tpu.memory_space<vmem>>
      %39 = tpu.memref_squeeze %38 : memref<1x1x128xf32, #tpu.memory_space<vmem>> -> memref<1x128xf32, #tpu.memory_space<vmem>>
      tpu.enqueue_dma source(%37 : memref<1x128xf32, #tpu.memory_space<any>>) target(%39 : memref<1x128xf32, #tpu.memory_space<vmem>>) target_semaphore(%arg5 : memref<!tpu.dma_semaphore, #tpu.memory_space<semaphore_mem>>)
    }
    %c8_i32_0 = arith.constant 8 : i32
    %c0_i32_1 = arith.constant 0 : i32
    %c8_i32_2 = arith.constant 8 : i32
    %1 = arith.addi %c0_i32_1, %c8_i32_2 : i32
    %c1_i32_3 = arith.constant 1 : i32
    scf.for %arg6 = %c0_i32_1 to %1 step %c1_i32_3  : i32 {
      %c8_i32_37 = arith.constant 8 : i32
      %34 = arith.addi %c8_i32_37, %arg6 : i32
      %35 = arith.index_cast %34 : i32 to index
      %36 = memref.load %arg1[%35] : memref<56xi32, #tpu.memory_space<smem>>
      %c1_i32_38 = arith.constant 1 : i32
      %c0_i32_39 = arith.constant 0 : i32
      %37 = tpu.memref_slice %arg2[%36, %c0_i32_39] : memref<32x128xf32, #tpu.memory_space<any>> -> memref<1x128xf32, #tpu.memory_space<any>>
      %c0_i32_40 = arith.constant 0 : i32
      %38 = tpu.memref_slice %arg4[%c1_i32_38, %arg6, %c0_i32_40] : memref<7x8x128xf32, #tpu.memory_space<vmem>> -> memref<1x1x128xf32, #tpu.memory_space<vmem>>
      %39 = tpu.memref_squeeze %38 : memref<1x1x128xf32, #tpu.memory_space<vmem>> -> memref<1x128xf32, #tpu.memory_space<vmem>>
      tpu.enqueue_dma source(%37 : memref<1x128xf32, #tpu.memory_space<any>>) target(%39 : memref<1x128xf32, #tpu.memory_space<vmem>>) target_semaphore(%arg5 : memref<!tpu.dma_semaphore, #tpu.memory_space<semaphore_mem>>)
    }
    %c8_i32_4 = arith.constant 8 : i32
    %c0_i32_5 = arith.constant 0 : i32
    %c8_i32_6 = arith.constant 8 : i32
    %2 = arith.addi %c0_i32_5, %c8_i32_6 : i32
    %c1_i32_7 = arith.constant 1 : i32
    scf.for %arg6 = %c0_i32_5 to %2 step %c1_i32_7  : i32 {
      %c16_i32 = arith.constant 16 : i32
      %34 = arith.addi %c16_i32, %arg6 : i32
      %35 = arith.index_cast %34 : i32 to index
      %36 = memref.load %arg1[%35] : memref<56xi32, #tpu.memory_space<smem>>
      %c2_i32 = arith.constant 2 : i32
      %c0_i32_37 = arith.constant 0 : i32
      %37 = tpu.memref_slice %arg2[%36, %c0_i32_37] : memref<32x128xf32, #tpu.memory_space<any>> -> memref<1x128xf32, #tpu.memory_space<any>>
      %c0_i32_38 = arith.constant 0 : i32
      %38 = tpu.memref_slice %arg4[%c2_i32, %arg6, %c0_i32_38] : memref<7x8x128xf32, #tpu.memory_space<vmem>> -> memref<1x1x128xf32, #tpu.memory_space<vmem>>
      %39 = tpu.memref_squeeze %38 : memref<1x1x128xf32, #tpu.memory_space<vmem>> -> memref<1x128xf32, #tpu.memory_space<vmem>>
      tpu.enqueue_dma source(%37 : memref<1x128xf32, #tpu.memory_space<any>>) target(%39 : memref<1x128xf32, #tpu.memory_space<vmem>>) target_semaphore(%arg5 : memref<!tpu.dma_semaphore, #tpu.memory_space<semaphore_mem>>)
    }
    %c8_i32_8 = arith.constant 8 : i32
    %c0_i32_9 = arith.constant 0 : i32
    %c8_i32_10 = arith.constant 8 : i32
    %3 = arith.addi %c0_i32_9, %c8_i32_10 : i32
    %c1_i32_11 = arith.constant 1 : i32
    scf.for %arg6 = %c0_i32_9 to %3 step %c1_i32_11  : i32 {
      %c24_i32 = arith.constant 24 : i32
      %34 = arith.addi %c24_i32, %arg6 : i32
      %35 = arith.index_cast %34 : i32 to index
      %36 = memref.load %arg1[%35] : memref<56xi32, #tpu.memory_space<smem>>
      %c3_i32 = arith.constant 3 : i32
      %c0_i32_37 = arith.constant 0 : i32
      %37 = tpu.memref_slice %arg2[%36, %c0_i32_37] : memref<32x128xf32, #tpu.memory_space<any>> -> memref<1x128xf32, #tpu.memory_space<any>>
      %c0_i32_38 = arith.constant 0 : i32
      %38 = tpu.memref_slice %arg4[%c3_i32, %arg6, %c0_i32_38] : memref<7x8x128xf32, #tpu.memory_space<vmem>> -> memref<1x1x128xf32, #tpu.memory_space<vmem>>
      %39 = tpu.memref_squeeze %38 : memref<1x1x128xf32, #tpu.memory_space<vmem>> -> memref<1x128xf32, #tpu.memory_space<vmem>>
      tpu.enqueue_dma source(%37 : memref<1x128xf32, #tpu.memory_space<any>>) target(%39 : memref<1x128xf32, #tpu.memory_space<vmem>>) target_semaphore(%arg5 : memref<!tpu.dma_semaphore, #tpu.memory_space<semaphore_mem>>)
    }
    %c8_i32_12 = arith.constant 8 : i32
    %c0_i32_13 = arith.constant 0 : i32
    %c8_i32_14 = arith.constant 8 : i32
    %4 = arith.addi %c0_i32_13, %c8_i32_14 : i32
    %c1_i32_15 = arith.constant 1 : i32
    scf.for %arg6 = %c0_i32_13 to %4 step %c1_i32_15  : i32 {
      %c32_i32 = arith.constant 32 : i32
      %34 = arith.addi %c32_i32, %arg6 : i32
      %35 = arith.index_cast %34 : i32 to index
      %36 = memref.load %arg1[%35] : memref<56xi32, #tpu.memory_space<smem>>
      %c4_i32 = arith.constant 4 : i32
      %c0_i32_37 = arith.constant 0 : i32
      %37 = tpu.memref_slice %arg2[%36, %c0_i32_37] : memref<32x128xf32, #tpu.memory_space<any>> -> memref<1x128xf32, #tpu.memory_space<any>>
      %c0_i32_38 = arith.constant 0 : i32
      %38 = tpu.memref_slice %arg4[%c4_i32, %arg6, %c0_i32_38] : memref<7x8x128xf32, #tpu.memory_space<vmem>> -> memref<1x1x128xf32, #tpu.memory_space<vmem>>
      %39 = tpu.memref_squeeze %38 : memref<1x1x128xf32, #tpu.memory_space<vmem>> -> memref<1x128xf32, #tpu.memory_space<vmem>>
      tpu.enqueue_dma source(%37 : memref<1x128xf32, #tpu.memory_space<any>>) target(%39 : memref<1x128xf32, #tpu.memory_space<vmem>>) target_semaphore(%arg5 : memref<!tpu.dma_semaphore, #tpu.memory_space<semaphore_mem>>)
    }
    %c8_i32_16 = arith.constant 8 : i32
    %c0_i32_17 = arith.constant 0 : i32
    %c8_i32_18 = arith.constant 8 : i32
    %5 = arith.addi %c0_i32_17, %c8_i32_18 : i32
    %c1_i32_19 = arith.constant 1 : i32
    scf.for %arg6 = %c0_i32_17 to %5 step %c1_i32_19  : i32 {
      %c40_i32 = arith.constant 40 : i32
      %34 = arith.addi %c40_i32, %arg6 : i32
      %35 = arith.index_cast %34 : i32 to index
      %36 = memref.load %arg1[%35] : memref<56xi32, #tpu.memory_space<smem>>
      %c5_i32 = arith.constant 5 : i32
      %c0_i32_37 = arith.constant 0 : i32
      %37 = tpu.memref_slice %arg2[%36, %c0_i32_37] : memref<32x128xf32, #tpu.memory_space<any>> -> memref<1x128xf32, #tpu.memory_space<any>>
      %c0_i32_38 = arith.constant 0 : i32
      %38 = tpu.memref_slice %arg4[%c5_i32, %arg6, %c0_i32_38] : memref<7x8x128xf32, #tpu.memory_space<vmem>> -> memref<1x1x128xf32, #tpu.memory_space<vmem>>
      %39 = tpu.memref_squeeze %38 : memref<1x1x128xf32, #tpu.memory_space<vmem>> -> memref<1x128xf32, #tpu.memory_space<vmem>>
      tpu.enqueue_dma source(%37 : memref<1x128xf32, #tpu.memory_space<any>>) target(%39 : memref<1x128xf32, #tpu.memory_space<vmem>>) target_semaphore(%arg5 : memref<!tpu.dma_semaphore, #tpu.memory_space<semaphore_mem>>)
    }
    %c8_i32_20 = arith.constant 8 : i32
    %c0_i32_21 = arith.constant 0 : i32
    %c8_i32_22 = arith.constant 8 : i32
    %6 = arith.addi %c0_i32_21, %c8_i32_22 : i32
    %c1_i32_23 = arith.constant 1 : i32
    scf.for %arg6 = %c0_i32_21 to %6 step %c1_i32_23  : i32 {
      %c48_i32 = arith.constant 48 : i32
      %34 = arith.addi %c48_i32, %arg6 : i32
      %35 = arith.index_cast %34 : i32 to index
      %36 = memref.load %arg1[%35] : memref<56xi32, #tpu.memory_space<smem>>
      %c6_i32 = arith.constant 6 : i32
      %c0_i32_37 = arith.constant 0 : i32
      %37 = tpu.memref_slice %arg2[%36, %c0_i32_37] : memref<32x128xf32, #tpu.memory_space<any>> -> memref<1x128xf32, #tpu.memory_space<any>>
      %c0_i32_38 = arith.constant 0 : i32
      %38 = tpu.memref_slice %arg4[%c6_i32, %arg6, %c0_i32_38] : memref<7x8x128xf32, #tpu.memory_space<vmem>> -> memref<1x1x128xf32, #tpu.memory_space<vmem>>
      %39 = tpu.memref_squeeze %38 : memref<1x1x128xf32, #tpu.memory_space<vmem>> -> memref<1x128xf32, #tpu.memory_space<vmem>>
      tpu.enqueue_dma source(%37 : memref<1x128xf32, #tpu.memory_space<any>>) target(%39 : memref<1x128xf32, #tpu.memory_space<vmem>>) target_semaphore(%arg5 : memref<!tpu.dma_semaphore, #tpu.memory_space<semaphore_mem>>)
    }
    %c8_i32_24 = arith.constant 8 : i32
    %c0_i32_25 = arith.constant 0 : i32
    %c56_i32 = arith.constant 56 : i32
    %7 = arith.addi %c0_i32_25, %c56_i32 : i32
    %c1_i32_26 = arith.constant 1 : i32
    scf.for %arg6 = %c0_i32_25 to %7 step %c1_i32_26  : i32 {
      %c0_i32_37 = arith.constant 0 : i32
      %c0_i32_38 = arith.constant 0 : i32
      %c0_i32_39 = arith.constant 0 : i32
      %34 = tpu.memref_slice %arg2[%c0_i32_38, %c0_i32_39] : memref<32x128xf32, #tpu.memory_space<any>> -> memref<1x128xf32, #tpu.memory_space<any>>
      %c0_i32_40 = arith.constant 0 : i32
      %c0_i32_41 = arith.constant 0 : i32
      %35 = tpu.memref_slice %arg4[%c0_i32_37, %c0_i32_40, %c0_i32_41] : memref<7x8x128xf32, #tpu.memory_space<vmem>> -> memref<1x1x128xf32, #tpu.memory_space<vmem>>
      %36 = tpu.memref_squeeze %35 : memref<1x1x128xf32, #tpu.memory_space<vmem>> -> memref<1x128xf32, #tpu.memory_space<vmem>>
      tpu.wait_dma2 semaphore(%arg5 : memref<!tpu.dma_semaphore, #tpu.memory_space<semaphore_mem>>) src(%34 : memref<1x128xf32, #tpu.memory_space<any>>) dst(%36 : memref<1x128xf32, #tpu.memory_space<vmem>>)
    }
    %c0 = arith.constant 0 : index
    %c0_27 = arith.constant 0 : index
    %c0_28 = arith.constant 0 : index
    %8 = vector.load %arg4[%c0, %c0_27, %c0_28] : memref<7x8x128xf32, #tpu.memory_space<vmem>>, vector<7x8x128xf32>
    %9 = vector.extract_strided_slice %8 {offsets = [0, 0, 0], sizes = [1, 8, 128], strides = [1, 1, 1]} : vector<7x8x128xf32> to vector<1x8x128xf32>
    %10 = vector.shape_cast %9 : vector<1x8x128xf32> to vector<8x128xf32>
    %11 = vector.extract_strided_slice %8 {offsets = [1, 0, 0], sizes = [6, 8, 128], strides = [1, 1, 1]} : vector<7x8x128xf32> to vector<6x8x128xf32>
    %12 = vector.shape_cast %10 : vector<8x128xf32> to vector<1x8x128xf32>
    %13 = vector.broadcast %12 : vector<1x8x128xf32> to vector<6x8x128xf32>
    %14 = arith.subf %13, %11 : vector<6x8x128xf32>
    %cst = arith.constant 9.99999997E-7 : f32
    %15 = vector.broadcast %cst : f32 to vector<6x8x128xf32>
    %16 = arith.addf %14, %15 : vector<6x8x128xf32>
    %17 = arith.mulf %16, %16 : vector<6x8x128xf32>
    %cst_29 = arith.constant dense<0.000000e+00> : vector<6x8xf32>
    %18 = vector.multi_reduction <add>, %17, %cst_29 [2] : vector<6x8x128xf32> to vector<6x8xf32>
    %19 = math.sqrt %18 : vector<6x8xf32>
    %20 = vector.extract_strided_slice %19 {offsets = [0, 0], sizes = [5, 8], strides = [1, 1]} : vector<6x8xf32> to vector<5x8xf32>
    %21 = vector.extract_strided_slice %19 {offsets = [1, 0], sizes = [5, 8], strides = [1, 1]} : vector<6x8xf32> to vector<5x8xf32>
    %22 = arith.subf %20, %21 : vector<5x8xf32>
    %cst_30 = arith.constant 1.000000e+00 : f32
    %23 = vector.broadcast %cst_30 : f32 to vector<5x8xf32>
    %24 = arith.addf %22, %23 : vector<5x8xf32>
    %cst_31 = arith.constant 0.000000e+00 : f32
    %25 = vector.broadcast %cst_31 : f32 to vector<5x8xf32>
    %26 = arith.maximumf %24, %25 : vector<5x8xf32>
    %cst_32 = arith.constant dense<0.000000e+00> : vector<5xf32>
    %27 = vector.multi_reduction <add>, %26, %cst_32 [1] : vector<5x8xf32> to vector<5xf32>
    %28 = vector.shape_cast %27 : vector<5xf32> to vector<5x1xf32>
    %cst_33 = arith.constant dense<0.000000e+00> : vector<1xf32>
    %29 = vector.multi_reduction <add>, %28, %cst_33 [0] : vector<5x1xf32> to vector<1xf32>
    %30 = vector.shape_cast %29 : vector<1xf32> to vector<1x1xf32>
    %cst_34 = arith.constant 1.250000e-01 : f32
    %31 = vector.broadcast %cst_34 : f32 to vector<1x1xf32>
    %32 = arith.mulf %30, %31 : vector<1x1xf32>
    %c0_35 = arith.constant 0 : index
    %c0_36 = arith.constant 0 : index
    %33 = vector.load %arg3[%c0_35, %c0_36] : memref<1x1xf32, #tpu.memory_space<vmem>>, vector<1x1xf32>
    tpu.vector_store %arg3[%c0_35, %c0_36], %32 {strides = array<i32>} : memref<1x1xf32, #tpu.memory_space<vmem>>, vector<1x1xf32>,
    return
  }
  func.func @transform_1(%arg0: i32, %arg1: memref<56xi32, #tpu.memory_space<smem>>) -> (i32, i32) {
    %c0_i32 = arith.constant 0 : i32
    %c0_i32_0 = arith.constant 0 : i32
    %c0_i32_1 = arith.constant 0 : i32
    return %c0_i32, %c0_i32_0 : i32, i32
  }
}

</mosaic_0001>

<bundles_post_ra>
// kernel: triplet_embedding_loss.1
= control target key start
LH: loop header
LB: loop body
LE: loop exit
PB: predicated region body
PF: predicated region fallthrough
CT: control target
= control target key end

     0   :  { %s953_s0 = inlined_call_operand.vmem [shape: s32[56], index: 0, kind: input, shape index: {}]   ;;  %s954_s1 = inlined_call_operand.vmem [shape: f32[32,128], index: 1, kind: input, shape index: {}]   ;;  %s955_s2 = inlined_call_operand.hbm [shape: f32[1,1], index: 2, kind: output, shape index: {}]  }
   0x1   :  { %s7_s11 = sshll.u32 %s953_s0, 4  ;;  %s8_s11 = int_to_ptr.vmem [resolvable:$true] %s7_s11 }
   0x2   :  { %s792_s12 = scalar_lea.vmem %s8_s11, 16  ;;  %p797_p1 = scmp.lt.s32.totalorder %s8_s11, %s8_s11 }
   0x3   :  { %p793_p0 = scmp.ne.s32.totalorder %s8_s11, %s792_s12  ;;  %p798_p2 = scmp.lt.s32.totalorder %s792_s12, %s792_s12 }
   0x5   :  { %p799_p3 = por %p798_p2, %p797_p1 }
   0x7   :  { %p800_p4 = pnand %p799_p3, %p793_p0 }
   0x9   :  { %803 = shalt.err (!%p800_p4)  }
   0xa   :  { %s896_s13 = smov [#allocation5]  }
   0xb   :  { %10 = dma.vmem_to_smem %s8_s11, 16, %s896_s13, [#allocation4] }
   0xc   :  { %858 = dma.done.wait [#allocation4], 16 }
   0xd   :  { %859 = vsyncadd [#allocation4], 4294967280 }
   0xe   :  { %12 = sfence }
   0xf   :  { %13 = vsyncpa [#allocation7], 0  ;;  %s864_s14 = smov 0  }
  0x10 LB: > { %s20_s15 = sld [smem:[#allocation5 + %s866_s14]]  ;;  %s22_s18 = scalar_lea.vmem [#allocation2], %s866_s14  ;;  %s866_s14 = sphi %s864_s14, %s19_s14  }
  0x16   : > { %s21_s17 = scalar_lea.vmem %s954_s1, %s20_s15 }
  0x17   : > { %v40_v0 = vld [vmem:[%s21_s17] sm:$0x1] }
  0x18   : > { %41 = vst [vmem:[%s22_s18] sm:$0x1] %v40_v0 }
  0x19   : > { %66 = vsyncadd [#allocation3], 16  ;;  %s19_s14 = sadd.s32 1, %s866_s14  }
  0x1a   : > { %p16_p5 = scmp.ge.s32.totalorder %s19_s14, 8  }
  0x1b   :  { %s868_s19 = smov (%p16_p5), 0  }
  0x1c   :  { %18 = sbr.rel (!%p16_p5) target bundleno = 16 (0x10), region = 370 }
  0x23 LB: > { %s73_s20 = sadd.s32 8, %s870_s19  ;;  %s570_s25 = scalar_lea.vmem [#allocation2], %s870_s19  ;;  %s870_s19 = sphi %s868_s19, %s72_s19  }
  0x24   : > { %s74_s21 = sld [smem:[#allocation5 + %s73_s20]] }
  0x2a   : > { %s75_s24 = scalar_lea.vmem %s954_s1, %s74_s21 }
  0x2b   : > { %v94_v1 = vld [vmem:[%s75_s24] sm:$0x1] }
  0x2c   : > { %702 = vst [vmem:[%s570_s25 + $0x8] sm:$0x1] %v94_v1 }
  0x2d   : > { %120 = vsyncadd [#allocation3], 16  ;;  %s72_s19 = sadd.s32 1, %s870_s19  }
  0x2e   : > { %p69_p6 = scmp.ge.s32.totalorder %s72_s19, 8  }
  0x2f   :  { %s872_s26 = smov (%p69_p6), 0  }
  0x30   :  { %71 = sbr.rel (!%p69_p6) target bundleno = 35 (0x23), region = 381 }
  0x37 LB: > { %s127_s27 = sadd.s32 16, %s874_s26  ;;  %s576_s4 = scalar_lea.vmem [#allocation2], %s874_s26  ;;  %s874_s26 = sphi %s872_s26, %s126_s26  }
  0x38   : > { %s128_s28 = sld [smem:[#allocation5 + %s127_s27]] }
  0x3e   : > { %s129_s3 = scalar_lea.vmem %s954_s1, %s128_s28 }
  0x3f   : > { %v148_v2 = vld [vmem:[%s129_s3] sm:$0x1] }
  0x40   : > { %704 = vst [vmem:[%s576_s4 + $0x10] sm:$0x1] %v148_v2 }
  0x41   : > { %174 = vsyncadd [#allocation3], 16  ;;  %s126_s26 = sadd.s32 1, %s874_s26  }
  0x42   : > { %p123_p7 = scmp.ge.s32.totalorder %s126_s26, 8  }
  0x43   :  { %s876_s5 = smov (%p123_p7), 0  }
  0x44   :  { %125 = sbr.rel (!%p123_p7) target bundleno = 55 (0x37), region = 392 }
  0x4b LB: > { %s181_s6 = sadd.s32 24, %s878_s5  ;;  %s582_s11 = scalar_lea.vmem [#allocation2], %s878_s5  ;;  %s878_s5 = sphi %s876_s5, %s180_s5  }
  0x4c   : > { %s182_s7 = sld [smem:[#allocation5 + %s181_s6]] }
  0x52   : > { %s183_s10 = scalar_lea.vmem %s954_s1, %s182_s7 }
  0x53   : > { %v202_v3 = vld [vmem:[%s183_s10] sm:$0x1] }
  0x54   : > { %706 = vst [vmem:[%s582_s11 + $0x18] sm:$0x1] %v202_v3 }
  0x55   : > { %228 = vsyncadd [#allocation3], 16  ;;  %s180_s5 = sadd.s32 1, %s878_s5  }
  0x56   : > { %p177_p8 = scmp.ge.s32.totalorder %s180_s5, 8  }
  0x57   :  { %s880_s12 = smov (%p177_p8), 0  }
  0x58   :  { %179 = sbr.rel (!%p177_p8) target bundleno = 75 (0x4b), region = 403 }
  0x5f LB: > { %s235_s13 = sadd.s32 32, %s882_s12  ;;  %s588_s17 = scalar_lea.vmem [#allocation2], %s882_s12  ;;  %s882_s12 = sphi %s880_s12, %s234_s12  }
  0x60   : > { %s236_s14 = sld [smem:[#allocation5 + %s235_s13]] }
  0x66   : > { %s237_s16 = scalar_lea.vmem %s954_s1, %s236_s14 }
  0x67   : > { %v256_v4 = vld [vmem:[%s237_s16] sm:$0x1] }
  0x68   : > { %708 = vst [vmem:[%s588_s17 + $0x20] sm:$0x1] %v256_v4 }
  0x69   : > { %282 = vsyncadd [#allocation3], 16  ;;  %s234_s12 = sadd.s32 1, %s882_s12  }
  0x6a   : > { %p231_p9 = scmp.ge.s32.totalorder %s234_s12, 8  }
  0x6b   :  { %s884_s18 = smov (%p231_p9), 0  }
  0x6c   :  { %233 = sbr.rel (!%p231_p9) target bundleno = 95 (0x5f), region = 414 }
  0x73 LB: > { %s289_s19 = sadd.s32 40, %s886_s18  ;;  %s594_s24 = scalar_lea.vmem [#allocation2], %s886_s18  ;;  %s886_s18 = sphi %s884_s18, %s288_s18  }
  0x74   : > { %s290_s20 = sld [smem:[#allocation5 + %s289_s19]] }
  0x7a   : > { %s291_s23 = scalar_lea.vmem %s954_s1, %s290_s20 }
  0x7b   : > { %v310_v5 = vld [vmem:[%s291_s23] sm:$0x1] }
  0x7c   : > { %710 = vst [vmem:[%s594_s24 + $0x28] sm:$0x1] %v310_v5 }
  0x7d   : > { %336 = vsyncadd [#allocation3], 16  ;;  %s288_s18 = sadd.s32 1, %s886_s18  }
  0x7e   : > { %p285_p10 = scmp.ge.s32.totalorder %s288_s18, 8  }
  0x7f   :  { %s888_s25 = smov (%p285_p10), 0  }
  0x80   :  { %287 = sbr.rel (!%p285_p10) target bundleno = 115 (0x73), region = 425 }
  0x87 LB: > { %s343_s26 = sadd.s32 48, %s890_s25  ;;  %s600_s3 = scalar_lea.vmem [#allocation2], %s890_s25  ;;  %s890_s25 = sphi %s888_s25, %s342_s25  }
  0x88   : > { %s344_s27 = sld [smem:[#allocation5 + %s343_s26]] }
  0x8e   : > { %s345_s30 = scalar_lea.vmem %s954_s1, %s344_s27 }
  0x8f   : > { %v364_v6 = vld [vmem:[%s345_s30] sm:$0x1] }
  0x90   : > { %712 = vst [vmem:[%s600_s3 + $0x30] sm:$0x1] %v364_v6 }
  0x91   : > { %390 = vsyncadd [#allocation3], 16  ;;  %s342_s25 = sadd.s32 1, %s890_s25  }
  0x92   : > { %p339_p11 = scmp.ge.s32.totalorder %s342_s25, 8  }
  0x93   :  { %s892_s4 = smov (%p339_p11), 0  }
  0x94   :  { %341 = sbr.rel (!%p339_p11) target bundleno = 135 (0x87), region = 436 }
  0x9b LB: > { %860 = dma.done.wait [#allocation3], 16  ;;  %s894_s4 = sphi %s892_s4, %s396_s4  }
  0x9c   : > { %861 = vsyncadd [#allocation3], 4294967280  ;;  %s396_s4 = sadd.s32 1, %s894_s4  }
  0x9d   : > { %p393_p12 = scmp.ge.s32.totalorder %s396_s4, 56  }
  0x9e   :  { %v400_v7 = vld [vmem:[#allocation2] sm:$0xff] (%p393_p12)  ;;  %v403_v8 = vld [vmem:[#allocation2 + $0x18] sm:$0xff] (%p393_p12)  ;;  %v401_v9 = vld [vmem:[#allocation2 + $0x8] sm:$0xff] (%p393_p12)  ;;  %v499_v36 = vlaneseq (%p393_p12)  ;;  %vm521_vm12 = vcmask (%p393_p12), 1041409   ;;  %vm523_vm13 = vcmask (%p393_p12), 1042434   ;;  %vm525_vm14 = vcmask (%p393_p12), 1043459  }
  0x9f   :  { %395 = sbr.rel (!%p393_p12) target bundleno = 155 (0x9b), region = 447  ;;  %v409_v10 = vsub.f32 (%p393_p12), %v400_v7, %v403_v8  ;;  %v407_v11 = vsub.f32 (%p393_p12), %v400_v7, %v401_v9  ;;  %v404_v12 = vld [vmem:[#allocation2 + $0x20] sm:$0xff] (%p393_p12)  ;;  %v402_v13 = vld [vmem:[#allocation2 + $0x10] sm:$0xff] (%p393_p12)  ;;  %v405_v17 = vld [vmem:[#allocation2 + $0x28] sm:$0xff] (%p393_p12)  ;;  %vm527_vm15 = vcmask (%p393_p12), 1044484   ;;  %s897_s1 = smov (%p393_p12), [#allocation6]  }
  0xa0   :  { %v406_v14 = vld [vmem:[#allocation2 + $0x30] sm:$0xff] (%p393_p12)  ;;  %v410_v15 = vsub.f32 (%p393_p12), %v400_v7, %v404_v12  ;;  %v408_v16 = vsub.f32 (%p393_p12), %v400_v7, %v402_v13  ;;  %v411_v21 = vsub.f32 (%p393_p12), %v400_v7, %v405_v17  ;;  %v500_v39 = vand.u32 (%p393_p12), 127, %v499_v36  ;;  %s551_s5 = sshll.u32 (%p393_p12), %s897_s1, 4  ;;  %s552_s5 = int_to_ptr.vmem [resolvable:$true] %s551_s5 }
  0xa1   :  { %v415_v18 = vadd.f32 (%p393_p12), 1e-06, %v409_v10  ;;  %v413_v19 = vadd.f32 (%p393_p12), 1e-06, %v407_v11  ;;  %v412_v20 = vsub.f32 (%p393_p12), %v400_v7, %v406_v14  ;;  %v502_v40 = vshrl.u32 (%p393_p12), %v499_v36, 7  ;;  %s804_s6 = scalar_lea.vmem (%p393_p12), %s552_s5, 16  ;;  %p809_p0 = scmp.lt.s32.totalorder (%p393_p12), %s552_s5, %s552_s5 }
  0xa2   :  { %v416_v22 = vadd.f32 (%p393_p12), 1e-06, %v410_v15  ;;  %v414_v23 = vadd.f32 (%p393_p12), 1e-06, %v408_v16  ;;  %v417_v29 = vadd.f32 (%p393_p12), 1e-06, %v411_v21  ;;  %p805_p13 = scmp.ne.s32.totalorder (%p393_p12), %s552_s5, %s804_s6 }
  0xa3   :  { %v421_v24 = vmul.f32 (%p393_p12), %v415_v18, %v415_v18  ;;  %v419_v25 = vmul.f32 (%p393_p12), %v413_v19, %v413_v19  ;;  %v418_v28 = vadd.f32 (%p393_p12), 1e-06, %v412_v20  ;;  %v503_v46 = vsub.s32 (%p393_p12), %v500_v39, %v502_v40  ;;  %s808_s7 = scalar_lea.vmem (%p393_p12), %s552_s5, 32 }
  0xa4   :  { %v422_v26 = vmul.f32 (%p393_p12), %v416_v22, %v416_v22  ;;  %v420_v27 = vmul.f32 (%p393_p12), %v414_v23, %v414_v23  ;;  %v423_v31 = vmul.f32 (%p393_p12), %v417_v29, %v417_v29  ;;  %p810_p1 = scmp.lt.s32.totalorder (%p393_p12), %s808_s7, %s804_s6 }
  0xa5   :  { %429 = vadd.xlane.f32.xlu1 (%p393_p12), %v421_v24  ;;  %425 = vadd.xlane.f32.xlu0 (%p393_p12), %v419_v25  ;;  %v424_v30 = vmul.f32 (%p393_p12), %v418_v28, %v418_v28 }
  0xa6   :  { %p811_p2 = por %p810_p1, %p809_p0 }
  0xa8   :  { %p812_p3 = pnand %p811_p2, %p805_p13 }
  0xa9   :  { %431 = vadd.xlane.f32.xlu1 %v422_v26  ;;  %427 = vadd.xlane.f32.xlu0 %v420_v27 }
  0xad   :  { %435 = vadd.xlane.f32.xlu1 %v424_v30  ;;  %433 = vadd.xlane.f32.xlu0 %v423_v31 }
 0x132   :  { %v430_v32 = vpop.xlane.xlu1 %429  ;;  %v426_v33 = vpop.xlane.xlu0 %425 }
 0x133   :  { %780 = vrsqrt.f32 %v430_v32  ;;  %vm453_vm0 = vcmp.eq.f32.partialorder %v430_v32, inf  ;;  %vm455_vm1 = vcmp.eq.f32.partialorder %v430_v32, 0.0  ;;  %v456_v45 = vand.u32 2147483648, %v430_v32 }
 0x134   :  { %782 = vrsqrt.f32 %v426_v33  ;;  %vm439_vm2 = vcmp.eq.f32.partialorder %v426_v33, inf  ;;  %vm441_vm3 = vcmp.eq.f32.partialorder %v426_v33, 0.0  ;;  %v442_v48 = vand.u32 2147483648, %v426_v33 }
 0x136   :  { %v432_v34 = vpop.xlane.xlu1 %431  ;;  %v428_v35 = vpop.xlane.xlu0 %427 }
 0x137   :  { %784 = vrsqrt.f32 %v432_v34  ;;  %vm460_vm4 = vcmp.eq.f32.partialorder %v432_v34, inf  ;;  %vm462_vm5 = vcmp.eq.f32.partialorder %v432_v34, 0.0  ;;  %v463_v52 = vand.u32 2147483648, %v432_v34 }
 0x138   :  { %786 = vrsqrt.f32 %v428_v35  ;;  %vm446_vm6 = vcmp.eq.f32.partialorder %v428_v35, inf  ;;  %vm448_vm7 = vcmp.eq.f32.partialorder %v428_v35, 0.0  ;;  %v449_v56 = vand.u32 2147483648, %v428_v35 }
 0x13a   :  { %v436_v37 = vpop.xlane.xlu1 %435  ;;  %v434_v38 = vpop.xlane.xlu0 %433 }
 0x13b   :  { %788 = vrsqrt.f32 %v436_v37  ;;  %vm474_vm8 = vcmp.eq.f32.partialorder %v436_v37, inf  ;;  %vm476_vm9 = vcmp.eq.f32.partialorder %v436_v37, 0.0  ;;  %v477_v59 = vand.u32 2147483648, %v436_v37 }
 0x13c   :  { %790 = vrsqrt.f32 %v434_v38  ;;  %vm467_vm10 = vcmp.eq.f32.partialorder %v434_v38, inf  ;;  %vm469_vm11 = vcmp.eq.f32.partialorder %v434_v38, 0.0  ;;  %v470_v7 = vand.u32 2147483648, %v434_v38 }
 0x13d   :  { %v781_v41 = vpop.eup %780 }
 0x13e   :  { %v783_v42 = vpop.eup %782  ;;  %v452_v43 = vmul.f32 %v781_v41, %v430_v32 }
 0x13f   :  { %v438_v44 = vmul.f32 %v783_v42, %v426_v33 }
 0x140   :  { %v454_v50 = vsel %vm453_vm0, %v430_v32, %v452_v43  ;;  %vm530_vm0 = vcmask 61440  }
 0x141   :  { %v785_v47 = vpop.eup %784  ;;  %v440_v53 = vsel %vm439_vm2, %v426_v33, %v438_v44  ;;  %v457_v60 = vsel %vm455_vm1, %v456_v45, %v454_v50  ;;  %vm534_vm1 = vcmask 1044480   ;;  %vm543_vm2 = vcmask 0  }
 0x142   :  { %v787_v49 = vpop.eup %786  ;;  %v459_v51 = vmul.f32 %v785_v47, %v432_v34  ;;  %v443_v63 = vsel %vm441_vm3, %v442_v48, %v440_v53 }
 0x143   :  { %v445_v54 = vmul.f32 %v787_v49, %v428_v35 }
 0x144   :  { %v461_v55 = vsel %vm460_vm4, %v432_v34, %v459_v51 }
 0x145   :  { %v789_v57 = vpop.eup %788  ;;  %v447_v58 = vsel %vm446_vm6, %v428_v35, %v445_v54  ;;  %v464_v61 = vsel %vm462_vm5, %v463_v52, %v461_v55 }
 0x146   :  { %v791_v62 = vpop.eup %790  ;;  %v450_v0 = vsel %vm448_vm7, %v449_v56, %v447_v58  ;;  %v473_v1 = vmul.f32 %v789_v57, %v436_v37  ;;  %v481_v2 = vsub.f32 %v457_v60, %v464_v61 }
 0x147   :  { %v479_v3 = vsub.f32 %v443_v63, %v450_v0  ;;  %v466_v4 = vmul.f32 %v791_v62, %v434_v38  ;;  %v480_v5 = vsub.f32 %v450_v0, %v457_v60 }
 0x148   :  { %v475_v6 = vsel %vm474_vm8, %v436_v37, %v473_v1  ;;  %v486_v8 = vadd.f32 1.0, %v481_v2 }
 0x149   :  { %v468_v9 = vsel %vm467_vm10, %v434_v38, %v466_v4  ;;  %v478_v10 = vsel %vm476_vm9, %v477_v59, %v475_v6  ;;  %v484_v11 = vadd.f32 1.0, %v479_v3  ;;  %v485_v12 = vadd.f32 1.0, %v480_v5 }
 0x14a   :  { %v471_v13 = vsel %vm469_vm11, %v470_v7, %v468_v9  ;;  %v491_v14 = vmax.f32 %v486_v8, 0.0 }
 0x14b   :  { %v482_v15 = vsub.f32 %v464_v61, %v471_v13  ;;  %v483_v16 = vsub.f32 %v471_v13, %v478_v10  ;;  %v489_v17 = vmax.f32 %v484_v11, 0.0  ;;  %v490_v18 = vmax.f32 %v485_v12, 0.0 }
 0x14c   :  { %v512_v23 = vrot.slane %v491_v14, %v503_v46 }
 0x14d   :  { %v487_v19 = vadd.f32 1.0, %v482_v15  ;;  %v488_v20 = vadd.f32 1.0, %v483_v16  ;;  %v504_v21 = vrot.slane %v489_v17, %v503_v46  ;;  %v508_v22 = vrot.slane %v490_v18, %v503_v46 }
 0x14f   :  { %v492_v24 = vmax.f32 %v487_v19, 0.0  ;;  %v493_v25 = vmax.f32 %v488_v20, 0.0  ;;  %v522_v26 = vsel %vm521_vm12, %v508_v22, %v504_v21 }
 0x150   :  { %v524_v29 = vsel %vm523_vm13, %v512_v23, %v522_v26 }
 0x151   :  { %v516_v27 = vrot.slane %v492_v24, %v503_v46  ;;  %v520_v28 = vrot.slane %v493_v25, %v503_v46 }
 0x153   :  { %v526_v30 = vsel %vm525_vm14, %v516_v27, %v524_v29 }
 0x154   :  { %v528_v31 = vsel %vm527_vm15, %v520_v28, %v526_v30 }
 0x155   :  { %v531_v32 = vsel %vm530_vm0, %v528_v31, 0.0 }
 0x156   :  { %532 = vadd.xlane.f32.xlu0 %v531_v32 }
 0x1e3   :  { %v533_v33 = vpop.xlane.xlu0 %532 }
 0x1e4   :  { %v535_v34 = vsel %vm534_vm1, %v533_v33, 0.0 }
 0x1e5   :  { %v536_v35 = vrot.slane %v535_v34, 4 }
 0x1e7   :  { %v537_v36 = vadd.f32 %v536_v35, %v535_v34 }
 0x1e9   :  { %v538_v37 = vrot.slane %v537_v36, 2 }
 0x1eb   :  { %v539_v38 = vadd.f32 %v538_v37, %v537_v36 }
 0x1ed   :  { %v540_v39 = vrot.slane %v539_v38, 1 }
 0x1ef   :  { %v541_v40 = vadd.f32 %v540_v39, %v539_v38 }
 0x1f1   :  { %v542_v41 = vmul.f32 0.125, %v541_v40 }
 0x1f3   :  { %544 = vst.msk [vmem:[#allocation6] sm:$0x1] %vm543_vm2, %v542_v41 }
 0x1f4   :  { %815 = shalt.err (!%p812_p3)
}
 0x1f5   :  { %s816_s10 = scalar_lea.hbm %s955_s2, 16 }
 0x1f6   :  { %p817_p4 = scmp.ne.s32.totalorder %s955_s2, %s816_s10  ;;  %p820_p5 = scmp.lt.u32.totalorder %s816_s10, %s955_s2 }
 0x1f8   :  { %p822_p6 = pnand %p820_p5, %p817_p4 }
 0x1fa   :  { %825 = shalt.err (!%p822_p6)
}
 0x1fb   :  { %554 = dma.vmem_to_hbm [thread:$0]  %s552_s5, 16, %s955_s2, [#allocation7]  }
 0x1fc   :  { %862 = dma.done.wait [#allocation7], 16  }
 0x1fd   :  { %863 = vsyncadd [#allocation7], 4294967280 }
 0x1fe   :  { %558 = vsyncpa [#allocation7], 1 }
 0x1ff   :  { %559 = vsyncmov [#allocation3] }
 0x202   :  { %s560_s16 = vpop.sfrf %559 }
 0x203   :  { %p713_p7 = scmp.ne.s32.totalorder %s560_s16, 0 }
 0x205   :  { %564 = shalt.err (%p713_p7)  }

</bundles_post_ra>
